<compile_context>
chip_gen: v7x
topology: tpu7x:2x2x1
jax: 0.10.0
libtpu: 0.0.40
codegen_flags: <defaults>
</compile_context>

<pallas_src>
import functools

import jax
import jax.numpy as jnp
from jax.experimental import pallas as pl
from jax.experimental.pallas import tpu as pltpu

LANE = 128
SUBLANE = 8


def _round_up(x, m):
    return (x + m - 1) // m * m


def _mlp_kernel(*refs, n_layers):
    """refs = (x_ref, w0_ref, b0_ref, w1_ref, b1_ref, ..., out_ref).

    All operands are VMEM-resident blocks.  The Python loop over layers is
    unrolled at trace time; activations never leave the chip.
    """
    x_ref = refs[0]
    out_ref = refs[-1]
    h = x_ref[...]
    for i in range(n_layers):
        w = refs[1 + 2 * i][...]          # [Kp_i, Np_i]  lane-padded, pre-transposed
        b = refs[2 + 2 * i][...]          # [1,    Np_i]  lane-padded
        h = jnp.dot(h, w, preferred_element_type=jnp.float32) + b
        if i < n_layers - 1:              # hidden layers: ReLU; last layer: linear
            h = jnp.maximum(h, 0.0)
    out_ref[...] = h.astype(out_ref.dtype)


def init_params(layers, key):
    """PyTorch nn.Linear-style params: W [out_f, in_f], b [out_f]."""
    params = []
    for i in range(len(layers) - 1):
        in_f, out_f = layers[i], layers[i + 1]
        key, kw, kb = jax.random.split(key, 3)
        bound = 1.0 / jnp.sqrt(jnp.float32(in_f))
        w = jax.random.uniform(kw, (out_f, in_f), jnp.float32, -bound, bound)
        b = jax.random.uniform(kb, (out_f,), jnp.float32, -bound, bound)
        params.append((w, b))
    return params


def prepare_params(params):
    """One-time prep: transpose to [in_f, out_f] and zero-pad feature dims to
    multiples of 128 lanes.  Done once, outside the hot path."""
    prepared = []
    for w, b in params:
        out_f, in_f = w.shape
        kp = _round_up(in_f, LANE)
        np_ = _round_up(out_f, LANE)
        w_t = jnp.zeros((kp, np_), jnp.float32).at[:in_f, :out_f].set(w.T)
        b2 = jnp.zeros((1, np_), jnp.float32).at[:, :out_f].set(b)
        prepared.append((w_t, b2))
    return prepared


@functools.partial(jax.jit, static_argnames=("out_dim",))
def custom_net_forward(x, prepared, *, out_dim):
    """Fused CustomNet forward: one pallas_call for the entire MLP."""
    M, K = x.shape
    n_layers = len(prepared)
    Kp = prepared[0][0].shape[0]
    Np_out = prepared[-1][0].shape[1]

    # Batch tile: multiple of 8 sublanes; cap at 512 rows (HBM-roofline sweet
    # spot) so large batches grid nicely and shard across TCs.
    tm = min(_round_up(M, SUBLANE), 512)
    Mp = _round_up(M, tm)

    # Pad input once (zeros in padded K columns hit zero weight rows).
    xp = jnp.zeros((Mp, Kp), jnp.float32).at[:M, :K].set(x)

    grid = (Mp // tm,)

    flat_inputs = [xp]
    in_specs = [pl.BlockSpec((tm, Kp), lambda i: (i, 0))]
    for w_t, b2 in prepared:
        flat_inputs += [w_t, b2]
        in_specs += [
            # Constant block index -> weights/biases stay VMEM-resident
            # across batch tiles (no re-DMA per grid step).
            pl.BlockSpec(w_t.shape, lambda i: (0, 0)),
            pl.BlockSpec(b2.shape, lambda i: (0, 0)),
        ]
    out_spec = pl.BlockSpec((tm, Np_out), lambda i: (i, 0))

    # Advisory cost estimate (padded problem size) for XLA's scheduler.
    flops = 2 * Mp * sum(w.shape[0] * w.shape[1] for w, _ in prepared)
    bytes_accessed = (
        xp.size * 4
        + sum(w.size * 4 + b.size * 4 for w, b in prepared)
        + Mp * Np_out * 4
    )

    out_padded = pl.pallas_call(
        functools.partial(_mlp_kernel, n_layers=n_layers),
        out_shape=jax.ShapeDtypeStruct((Mp, Np_out), jnp.float32),
        grid=grid,
        in_specs=in_specs,
        out_specs=out_spec,
        compiler_params=pltpu.CompilerParams(
            dimension_semantics=("parallel",),   # batch tiles shard across TCs
        ),
        cost_estimate=pl.CostEstimate(
            flops=flops, transcendentals=0, bytes_accessed=bytes_accessed),
    )(*flat_inputs)

    # Lane-dense kernel output; real [M, out_dim] slice taken here (fused by jit).
    return out_padded[:M, :out_dim]


def custom_net_ref(x, params):
    """Pure-JAX reference matching the PyTorch CustomNet forward exactly."""
    n = len(params)
    for i, (w, b) in enumerate(params):
        x = x @ w.T + b
        if i < n - 1:
            x = jnp.maximum(x, 0.0)
    return x


if __name__ == "__main__":
    key = jax.random.PRNGKey(0)
    layers = [16, 32, 32, 8]   # small MLP consistent with CustomNet(layers)
    batch = 8

    key, kx = jax.random.split(key)
    x = jax.random.normal(kx, (batch, layers[0]), jnp.float32)

    params = init_params(layers, key)
    prepared = prepare_params(params)   # one-time transpose + lane padding

    out = custom_net_forward(x, prepared, out_dim=layers[-1])
    out = jax.block_until_ready(out)

    ref = custom_net_ref(x, params)
    assert out.shape == (batch, layers[-1])
    assert jnp.allclose(out, ref, atol=1e-5, rtol=1e-5), "mismatch vs reference"

    print("KERNEL_OK")
</pallas_src>

<mosaic_0001>
module attributes {stable_mosaic.version = 11 : i64} {
  func.func @_mlp_kernel(%arg0: i32, %arg1: memref<8x128xf32, #tpu.memory_space<vmem>>, %arg2: memref<128x128xf32, #tpu.memory_space<vmem>>, %arg3: memref<1x128xf32, #tpu.memory_space<vmem>>, %arg4: memref<128x128xf32, #tpu.memory_space<vmem>>, %arg5: memref<1x128xf32, #tpu.memory_space<vmem>>, %arg6: memref<128x128xf32, #tpu.memory_space<vmem>>, %arg7: memref<1x128xf32, #tpu.memory_space<vmem>>, %arg8: memref<8x128xf32, #tpu.memory_space<vmem>>) attributes {dimension_semantics = [#tpu.dimension_semantics<parallel>], iteration_bounds = array<i64: 1>, scalar_prefetch = 0 : i64, scratch_operands = 0 : i64, tpu.core_type = #tpu.core_type<tc>, window_params = [{transform_indices = @transform_0, window_bounds = array<i64: 8, 128>}, {pipeline_mode = #tpu.pipeline_mode<synchronous>, transform_indices = @transform_1, window_bounds = array<i64: 128, 128>}, {pipeline_mode = #tpu.pipeline_mode<synchronous>, transform_indices = @transform_2, window_bounds = array<i64: 1, 128>}, {pipeline_mode = #tpu.pipeline_mode<synchronous>, transform_indices = @transform_3, window_bounds = array<i64: 128, 128>}, {pipeline_mode = #tpu.pipeline_mode<synchronous>, transform_indices = @transform_4, window_bounds = array<i64: 1, 128>}, {pipeline_mode = #tpu.pipeline_mode<synchronous>, transform_indices = @transform_5, window_bounds = array<i64: 128, 128>}, {pipeline_mode = #tpu.pipeline_mode<synchronous>, transform_indices = @transform_6, window_bounds = array<i64: 1, 128>}, {transform_indices = @transform_7, window_bounds = array<i64: 8, 128>}]} {
    %c0 = arith.constant 0 : index
    %c0_0 = arith.constant 0 : index
    %0 = vector.load %arg1[%c0, %c0_0] : memref<8x128xf32, #tpu.memory_space<vmem>>, vector<8x128xf32>
    %c0_1 = arith.constant 0 : index
    %c0_2 = arith.constant 0 : index
    %1 = vector.load %arg2[%c0_1, %c0_2] : memref<128x128xf32, #tpu.memory_space<vmem>>, vector<128x128xf32>
    %c0_3 = arith.constant 0 : index
    %c0_4 = arith.constant 0 : index
    %2 = vector.load %arg3[%c0_3, %c0_4] : memref<1x128xf32, #tpu.memory_space<vmem>>, vector<1x128xf32>
    %cst = arith.constant dense<0.000000e+00> : vector<8x128xf32>
    %3 = tpu.matmul %0, %1, %cst {dimension_numbers = #tpu.dot_dimension_numbers<[1], [0], [0], [1], [0, 0, 1, 1], [], []>} : vector<8x128xf32>, vector<128x128xf32>, vector<8x128xf32> -> vector<8x128xf32>
    %4 = vector.broadcast %2 : vector<1x128xf32> to vector<8x128xf32>
    %5 = arith.addf %3, %4 : vector<8x128xf32>
    %cst_5 = arith.constant 0.000000e+00 : f32
    %6 = vector.broadcast %cst_5 : f32 to vector<8x128xf32>
    %7 = arith.maximumf %5, %6 : vector<8x128xf32>
    %c0_6 = arith.constant 0 : index
    %c0_7 = arith.constant 0 : index
    %8 = vector.load %arg4[%c0_6, %c0_7] : memref<128x128xf32, #tpu.memory_space<vmem>>, vector<128x128xf32>
    %c0_8 = arith.constant 0 : index
    %c0_9 = arith.constant 0 : index
    %9 = vector.load %arg5[%c0_8, %c0_9] : memref<1x128xf32, #tpu.memory_space<vmem>>, vector<1x128xf32>
    %cst_10 = arith.constant dense<0.000000e+00> : vector<8x128xf32>
    %10 = tpu.matmul %7, %8, %cst_10 {dimension_numbers = #tpu.dot_dimension_numbers<[1], [0], [0], [1], [0, 0, 1, 1], [], []>} : vector<8x128xf32>, vector<128x128xf32>, vector<8x128xf32> -> vector<8x128xf32>
    %11 = vector.broadcast %9 : vector<1x128xf32> to vector<8x128xf32>
    %12 = arith.addf %10, %11 : vector<8x128xf32>
    %cst_11 = arith.constant 0.000000e+00 : f32
    %13 = vector.broadcast %cst_11 : f32 to vector<8x128xf32>
    %14 = arith.maximumf %12, %13 : vector<8x128xf32>
    %c0_12 = arith.constant 0 : index
    %c0_13 = arith.constant 0 : index
    %15 = vector.load %arg6[%c0_12, %c0_13] : memref<128x128xf32, #tpu.memory_space<vmem>>, vector<128x128xf32>
    %c0_14 = arith.constant 0 : index
    %c0_15 = arith.constant 0 : index
    %16 = vector.load %arg7[%c0_14, %c0_15] : memref<1x128xf32, #tpu.memory_space<vmem>>, vector<1x128xf32>
    %cst_16 = arith.constant dense<0.000000e+00> : vector<8x128xf32>
    %17 = tpu.matmul %14, %15, %cst_16 {dimension_numbers = #tpu.dot_dimension_numbers<[1], [0], [0], [1], [0, 0, 1, 1], [], []>} : vector<8x128xf32>, vector<128x128xf32>, vector<8x128xf32> -> vector<8x128xf32>
    %18 = vector.broadcast %16 : vector<1x128xf32> to vector<8x128xf32>
    %19 = arith.addf %17, %18 : vector<8x128xf32>
    %c0_17 = arith.constant 0 : index
    %c0_18 = arith.constant 0 : index
    %20 = vector.load %arg8[%c0_17, %c0_18] : memref<8x128xf32, #tpu.memory_space<vmem>>, vector<8x128xf32>
    tpu.vector_store %arg8[%c0_17, %c0_18], %19 {strides = array<i32>} : memref<8x128xf32, #tpu.memory_space<vmem>>, vector<8x128xf32>,
    return
  }
  func.func @transform_0(%arg0: i32) -> (i32, i32) {
    %c0_i32 = arith.constant 0 : i32
    %c0_i32_0 = arith.constant 0 : i32
    return %arg0, %c0_i32 : i32, i32
  }
  func.func @transform_1(%arg0: i32) -> (i32, i32) {
    %c0_i32 = arith.constant 0 : i32
    %c0_i32_0 = arith.constant 0 : i32
    %c0_i32_1 = arith.constant 0 : i32
    return %c0_i32, %c0_i32_0 : i32, i32
  }
  func.func @transform_2(%arg0: i32) -> (i32, i32) {
    %c0_i32 = arith.constant 0 : i32
    %c0_i32_0 = arith.constant 0 : i32
    %c0_i32_1 = arith.constant 0 : i32
    return %c0_i32, %c0_i32_0 : i32, i32
  }
  func.func @transform_3(%arg0: i32) -> (i32, i32) {
    %c0_i32 = arith.constant 0 : i32
    %c0_i32_0 = arith.constant 0 : i32
    %c0_i32_1 = arith.constant 0 : i32
    return %c0_i32, %c0_i32_0 : i32, i32
  }
  func.func @transform_4(%arg0: i32) -> (i32, i32) {
    %c0_i32 = arith.constant 0 : i32
    %c0_i32_0 = arith.constant 0 : i32
    %c0_i32_1 = arith.constant 0 : i32
    return %c0_i32, %c0_i32_0 : i32, i32
  }
  func.func @transform_5(%arg0: i32) -> (i32, i32) {
    %c0_i32 = arith.constant 0 : i32
    %c0_i32_0 = arith.constant 0 : i32
    %c0_i32_1 = arith.constant 0 : i32
    return %c0_i32, %c0_i32_0 : i32, i32
  }
  func.func @transform_6(%arg0: i32) -> (i32, i32) {
    %c0_i32 = arith.constant 0 : i32
    %c0_i32_0 = arith.constant 0 : i32
    %c0_i32_1 = arith.constant 0 : i32
    return %c0_i32, %c0_i32_0 : i32, i32
  }
  func.func @transform_7(%arg0: i32) -> (i32, i32) {
    %c0_i32 = arith.constant 0 : i32
    %c0_i32_0 = arith.constant 0 : i32
    return %arg0, %c0_i32 : i32, i32
  }
}

</mosaic_0001>

<bundles_post_ra>
// kernel: custom_net_forward.1
= control target key start
LH: loop header
LB: loop body
LE: loop exit
PB: predicated region body
PF: predicated region fallthrough
CT: control target
= control target key end

     0   :  { %12 = vsyncpa [#allocation3], 0  ;;  %s856_s0 = inlined_call_operand.vmem [shape: f32[8,128], index: 0, kind: input, shape index: {}]   ;;  %s857_s1 = inlined_call_operand.hbm [shape: f32[128,128], index: 1, kind: input, shape index: {}]   ;;  %s858_s2 = inlined_call_operand.vmem [shape: f32[1,128], index: 2, kind: input, shape index: {}]   ;;  %s859_s3 = inlined_call_operand.hbm [shape: f32[128,128], index: 3, kind: input, shape index: {}]   ;;  %s860_s4 = inlined_call_operand.vmem [shape: f32[1,128], index: 4, kind: input, shape index: {}]   ;;  %s861_s5 = inlined_call_operand.hbm [shape: f32[128,128], index: 5, kind: input, shape index: {}]   ;;  %s862_s6 = inlined_call_operand.vmem [shape: f32[1,128], index: 6, kind: input, shape index: {}]   ;;  %s863_s7 = inlined_call_operand.hbm [shape: f32[8,128], index: 7, kind: output, shape index: {}]  }
   0x1   :  { %13 = vsyncpa [#allocation6], 0 }
   0x2   :  { %14 = vsyncpa [#allocation4], 0  ;;  %s701_s24 = smov [#allocation5]   ;;  %s702_s26 = smov [#allocation2]  }
   0x3   :  { %s36_s25 = sshll.u32 %s701_s24, 4  ;;  %s22_s27 = sshll.u32 %s702_s26, 4  ;;  %s37_s25 = int_to_ptr.vmem [resolvable:$true] %s36_s25  ;;  %s750_s27 = int_to_ptr.vmem [resolvable:$true] %s22_s27 }
   0x4   :  { %s607_s30 = scalar_lea.hbm %s859_s3, 2048 }
   0x5   :  { %p608_p0 = scmp.ne.s32.totalorder %s859_s3, %s607_s30  ;;  %p611_p1 = scmp.lt.u32.totalorder %s607_s30, %s859_s3 }
   0x7   :  { %p613_p2 = pnand %p611_p1, %p608_p0 }
   0x9   :  { %616 = shalt.err (!%p613_p2)
}
   0xa   :  { %s617_s12 = scalar_lea.vmem %s37_s25, 2048  ;;  %p622_p4 = scmp.lt.s32.totalorder %s37_s25, %s37_s25 }
   0xb   :  { %p618_p3 = scmp.ne.s32.totalorder %s37_s25, %s617_s12  ;;  %p623_p5 = scmp.lt.s32.totalorder %s617_s12, %s617_s12 }
   0xd   :  { %p624_p6 = por %p623_p5, %p622_p4 }
   0xf   :  { %p625_p7 = pnand %p624_p6, %p618_p3 }
  0x11   :  { %628 = shalt.err (!%p625_p7)
}
  0x12   :  { %s703_s13 = smov 128   ;;  %s704_s14 = smov 8  }
  0x13   :  { %42 = dma.hbm_to_vmem [thread:$0]  %s859_s3, 2048, %s37_s25, [#allocation6], %s703_s13, %s703_s13, %s704_s14  }
  0x14   :  { %s629_s19 = scalar_lea.hbm %s857_s1, 2048 }
  0x15   :  { %p630_p8 = scmp.ne.s32.totalorder %s857_s1, %s629_s19  ;;  %p633_p9 = scmp.lt.u32.totalorder %s629_s19, %s857_s1 }
  0x17   :  { %p635_p10 = pnand %p633_p9, %p630_p8 }
  0x19   :  { %638 = shalt.err (!%p635_p10)
}
  0x1a   :  { %s639_s24 = scalar_lea.vmem %s750_s27, 2048  ;;  %p644_p12 = scmp.lt.s32.totalorder %s750_s27, %s750_s27 }
  0x1b   :  { %p640_p11 = scmp.ne.s32.totalorder %s750_s27, %s639_s24  ;;  %p645_p13 = scmp.lt.s32.totalorder %s639_s24, %s639_s24 }
  0x1d   :  { %p646_p0 = por %p645_p13, %p644_p12 }
  0x1f   :  { %p647_p1 = pnand %p646_p0, %p640_p11 }
  0x21   :  { %650 = shalt.err (!%p647_p1)
}
  0x22   :  { %28 = dma.hbm_to_vmem [thread:$0]  %s857_s1, 2048, %s750_s27, [#allocation3], %s703_s13, %s703_s13, %s704_s14  }
  0x23   :  { %s705_s26 = smov [#allocation7]   ;;  %s651_s8 = scalar_lea.hbm %s861_s5, 2048 }
  0x24   :  { %s50_s28 = sshll.u32 %s705_s26, 4  ;;  %p652_p2 = scmp.ne.s32.totalorder %s861_s5, %s651_s8  ;;  %s51_s28 = int_to_ptr.vmem [resolvable:$true] %s50_s28 }
  0x25   :  { %p655_p3 = scmp.lt.u32.totalorder %s651_s8, %s861_s5 }
  0x27   :  { %p657_p4 = pnand %p655_p3, %p652_p2 }
  0x29   :  { %660 = shalt.err (!%p657_p4)
}
  0x2a   :  { %s661_s15 = scalar_lea.vmem %s51_s28, 2048  ;;  %p666_p6 = scmp.lt.s32.totalorder %s51_s28, %s51_s28 }
  0x2b   :  { %p662_p5 = scmp.ne.s32.totalorder %s51_s28, %s661_s15  ;;  %p667_p7 = scmp.lt.s32.totalorder %s661_s15, %s661_s15 }
  0x2d   :  { %p668_p8 = por %p667_p7, %p666_p6 }
  0x2f   :  { %p669_p9 = pnand %p668_p8, %p662_p5 }
  0x31   :  { %672 = shalt.err (!%p669_p9)
}
  0x32   :  { %56 = dma.hbm_to_vmem [thread:$0]  %s861_s5, 2048, %s51_s28, [#allocation6], %s703_s13, %s703_s13, %s704_s14  }
  0x33   :  { %695 = dma.done.wait [#allocation3], 2048  }
  0x34   :  { %696 = vsyncadd [#allocation3], 4294965248 }
  0x35   :  { %697 = dma.done.wait [#allocation6], 4096  }
  0x36   :  { %698 = vsyncadd [#allocation6], 4294963200  ;;  %v706_v0 = vmov 0.0|0.0   ;;  %vm707_vm0 = vmmov 0   ;;  %v708_v1 = vmov 0.0   ;;  %v69_v2 = vld [vmem:[#allocation2] sm:$0xff] }
  0x37   :  { %526 = vmatprep.subr.bf16.mxu0 %v706_v0  ;;  %453 = vmatprep.mubr.msk.f32.mxu0 %vm707_vm0, %v708_v1  ;;  %v70_v3 = vld [vmem:[#allocation2 + $0x8] sm:$0xff]  ;;  %v71_v4 = vld [vmem:[#allocation2 + $0x10] sm:$0xff]  ;;  %v72_v6 = vld [vmem:[#allocation2 + $0x18] sm:$0xff]  ;;  %s709_s19 = smov [#allocation8]  }
  0x38   :  { %550 = vmatprep.subr.bf16.mxu1 %v706_v0  ;;  %488 = vmatprep.mubr.msk.f32.mxu1 %vm707_vm0, %v708_v1  ;;  %v527_v5 = vpack.c.bf16 %v70_v3, %v69_v2  ;;  %v530_v7 = vpack.c.bf16 %v72_v6, %v71_v4  ;;  %v73_v8 = vld [vmem:[#allocation2 + $0x20] sm:$0xff]  ;;  %v74_v9 = vld [vmem:[#allocation2 + $0x28] sm:$0xff]  ;;  %v165_v12 = vld [vmem:[#allocation5 + $0x10] sm:$0xff]  ;;  %s357_s20 = sshll.u32 %s709_s19, 4  ;;  %s358_s20 = int_to_ptr.vmem [resolvable:$true] %s357_s20 }
  0x39   :  { %v163_v10 = vld [vmem:[#allocation5] sm:$0xff]  ;;  %v164_v11 = vld [vmem:[#allocation5 + $0x8] sm:$0xff]  ;;  %v166_v13 = vld [vmem:[#allocation5 + $0x18] sm:$0xff]  ;;  %v533_v14 = vpack.c.bf16 %v74_v9, %v73_v8  ;;  %s673_s21 = scalar_lea.vmem %s358_s20, 128  ;;  %p678_p11 = scmp.lt.s32.totalorder %s358_s20, %s358_s20 }
  0x3a   :  { %528 = vmatpush3.bf16.msra.mxu0 %v527_v5  ;;  %v551_v15 = vpack.c.bf16 %v164_v11, %v163_v10  ;;  %v75_v16 = vld [vmem:[#allocation2 + $0x30] sm:$0xff]  ;;  %v76_v17 = vld [vmem:[#allocation2 + $0x38] sm:$0xff]  ;;  %v554_v18 = vpack.c.bf16 %v166_v13, %v165_v12  ;;  %v167_v19 = vld [vmem:[#allocation5 + $0x20] sm:$0xff]  ;;  %p674_p10 = scmp.ne.s32.totalorder %s358_s20, %s673_s21  ;;  %p679_p12 = scmp.lt.s32.totalorder %s673_s21, %s673_s21 }
  0x3b   :  { %529 = vmatprep.subr.bf16.mxu0 %v706_v0  ;;  %v168_v20 = vld [vmem:[#allocation5 + $0x28] sm:$0xff]  ;;  %v536_v21 = vpack.c.bf16 %v76_v17, %v75_v16  ;;  %v77_v22 = vld [vmem:[#allocation2 + $0x40] sm:$0xff]  ;;  %v169_v25 = vld [vmem:[#allocation5 + $0x30] sm:$0xff] }
  0x3c   :  { %552 = vmatpush3.bf16.msra.mxu1 %v551_v15  ;;  %v78_v23 = vld [vmem:[#allocation2 + $0x48] sm:$0xff]  ;;  %v557_v24 = vpack.c.bf16 %v168_v20, %v167_v19  ;;  %v170_v26 = vld [vmem:[#allocation5 + $0x38] sm:$0xff]  ;;  %v79_v28 = vld [vmem:[#allocation2 + $0x50] sm:$0xff]  ;;  %p680_p13 = por %p679_p12, %p678_p11 }
  0x3d   :  { %553 = vmatprep.subr.bf16.mxu1 %v706_v0  ;;  %v539_v27 = vpack.c.bf16 %v78_v23, %v77_v22  ;;  %v80_v29 = vld [vmem:[#allocation2 + $0x58] sm:$0xff]  ;;  %v560_v30 = vpack.c.bf16 %v170_v26, %v169_v25  ;;  %v171_v31 = vld [vmem:[#allocation5 + $0x40] sm:$0xff]  ;;  %v172_v32 = vld [vmem:[#allocation5 + $0x48] sm:$0xff] }
  0x3e   :  { %531 = vmatpush3.bf16.msra.mxu0 %v530_v7  ;;  %v542_v33 = vpack.c.bf16 %v80_v29, %v79_v28  ;;  %v81_v34 = vld [vmem:[#allocation2 + $0x60] sm:$0xff]  ;;  %v82_v35 = vld [vmem:[#allocation2 + $0x68] sm:$0xff]  ;;  %v563_v36 = vpack.c.bf16 %v172_v32, %v171_v31  ;;  %v173_v37 = vld [vmem:[#allocation5 + $0x50] sm:$0xff]  ;;  %p681_p0 = pnand %p680_p13, %p674_p10 }
  0x3f   :  { %532 = vmatprep.subr.bf16.mxu0 %v706_v0  ;;  %v174_v38 = vld [vmem:[#allocation5 + $0x58] sm:$0xff]  ;;  %v545_v39 = vpack.c.bf16 %v82_v35, %v81_v34  ;;  %v83_v40 = vld [vmem:[#allocation2 + $0x70] sm:$0xff]  ;;  %v175_v43 = vld [vmem:[#allocation5 + $0x60] sm:$0xff] }
  0x40   :  { %555 = vmatpush3.bf16.msra.mxu1 %v554_v18  ;;  %v84_v41 = vld [vmem:[#allocation2 + $0x78] sm:$0xff]  ;;  %v566_v42 = vpack.c.bf16 %v174_v38, %v173_v37  ;;  %v176_v44 = vld [vmem:[#allocation5 + $0x68] sm:$0xff]  ;;  %v68_v47 = vld [vmem:[%s856_s0] sm:$0xff] }
  0x41   :  { %556 = vmatprep.subr.bf16.mxu1 %v706_v0  ;;  %v548_v45 = vpack.c.bf16 %v84_v41, %v83_v40  ;;  %v569_v46 = vpack.c.bf16 %v176_v44, %v175_v43  ;;  %v177_v48 = vld [vmem:[#allocation5 + $0x70] sm:$0xff]  ;;  %v178_v49 = vld [vmem:[#allocation5 + $0x78] sm:$0xff]  ;;  %v257_v51 = vld [vmem:[#allocation7] sm:$0xff] }
  0x42   :  { %534 = vmatpush3.bf16.msra.mxu0 %v533_v14  ;;  %v572_v50 = vpack.c.bf16 %v178_v49, %v177_v48  ;;  %v258_v52 = vld [vmem:[#allocation7 + $0x8] sm:$0xff]  ;;  %v259_v53 = vld [vmem:[#allocation7 + $0x10] sm:$0xff]  ;;  %v260_v55 = vld [vmem:[#allocation7 + $0x18] sm:$0xff] }
  0x43   :  { %535 = vmatprep.subr.bf16.mxu0 %v706_v0  ;;  %v575_v54 = vpack.c.bf16 %v258_v52, %v257_v51  ;;  %v578_v56 = vpack.c.bf16 %v260_v55, %v259_v53  ;;  %v261_v57 = vld [vmem:[#allocation7 + $0x20] sm:$0xff]  ;;  %v262_v58 = vld [vmem:[#allocation7 + $0x28] sm:$0xff]  ;;  %v263_v60 = vld [vmem:[#allocation7 + $0x30] sm:$0xff] }
  0x44   :  { %558 = vmatpush3.bf16.msra.mxu1 %v557_v24  ;;  %v581_v59 = vpack.c.bf16 %v262_v58, %v261_v57  ;;  %v264_v61 = vld [vmem:[#allocation7 + $0x38] sm:$0xff]  ;;  %v265_v63 = vld [vmem:[#allocation7 + $0x40] sm:$0xff]  ;;  %v267_v3 = vld [vmem:[#allocation7 + $0x50] sm:$0xff] }
  0x45   :  { %559 = vmatprep.subr.bf16.mxu1 %v706_v0  ;;  %v584_v62 = vpack.c.bf16 %v264_v61, %v263_v60  ;;  %v268_v4 = vld [vmem:[#allocation7 + $0x58] sm:$0xff]  ;;  %v269_v6 = vld [vmem:[#allocation7 + $0x60] sm:$0xff]  ;;  %v270_v7 = vld [vmem:[#allocation7 + $0x68] sm:$0xff] }
  0x46   :  { %537 = vmatpush3.bf16.msra.mxu0 %v536_v21  ;;  %v590_v5 = vpack.c.bf16 %v268_v4, %v267_v3  ;;  %v593_v8 = vpack.c.bf16 %v270_v7, %v269_v6  ;;  %v367_v9 = vld [vmem:[%s858_s2] ss:$0 sm:$0xff]  ;;  %v271_v14 = vld [vmem:[#allocation7 + $0x70] sm:$0xff]  ;;  %v272_v15 = vld [vmem:[#allocation7 + $0x78] sm:$0xff] }
  0x47   :  { %538 = vmatprep.subr.bf16.mxu0 %v706_v0  ;;  %v596_v16 = vpack.c.bf16 %v272_v15, %v271_v14  ;;  %v368_v17 = vld [vmem:[%s860_s4] ss:$0 sm:$0xff] }
  0x48   :  { %561 = vmatpush3.bf16.msra.mxu1 %v560_v30  ;;  %v369_v21 = vld [vmem:[%s862_s6] ss:$0 sm:$0xff] }
  0x49   :  { %562 = vmatprep.subr.bf16.mxu1 %v706_v0 }
  0x4a   :  { %540 = vmatpush3.bf16.msra.mxu0 %v539_v27 }
  0x4b   :  { %541 = vmatprep.subr.bf16.mxu0 %v706_v0 }
  0x4c   :  { %564 = vmatpush3.bf16.msra.mxu1 %v563_v36 }
  0x4d   :  { %565 = vmatprep.subr.bf16.mxu1 %v706_v0 }
  0x4e   :  { %543 = vmatpush3.bf16.msra.mxu0 %v542_v33 }
  0x4f   :  { %544 = vmatprep.subr.bf16.mxu0 %v706_v0 }
  0x50   :  { %567 = vmatpush3.bf16.msra.mxu1 %v566_v42 }
  0x51   :  { %568 = vmatprep.subr.bf16.mxu1 %v706_v0 }
  0x52   :  { %546 = vmatpush3.bf16.msra.mxu0 %v545_v39 }
  0x53   :  { %547 = vmatprep.subr.bf16.mxu0 %v706_v0 }
  0x54   :  { %570 = vmatpush3.bf16.msra.mxu1 %v569_v46 }
  0x55   :  { %571 = vmatprep.subr.bf16.mxu1 %v706_v0 }
  0x56   :  { %549 = vmatpush3.bf16.msra.mxu0 %v548_v45 }
  0x57   :  { %574 = vmatprep.subr.bf16.mxu0 %v706_v0 }
  0x58   :  { %573 = vmatpush3.bf16.msra.mxu1 %v572_v50 }
  0x59   :  { %454 = vmatmul.mubr.f32.vlgmr.msra.gmra.mrb[0].mxu0 %v68_v47 }
  0x5a   :  { %523 = vmatprep.mubr.msk.f32.mxu0 %vm707_vm0, %v708_v1  ;;  %576 = vmatpush3.bf16.msra.mxu0 %v575_v54  ;;  %v266_v1 = vld [vmem:[#allocation7 + $0x48] sm:$0xff] }
  0x5b   :  { %577 = vmatprep.subr.bf16.mxu0 %v706_v0  ;;  %v587_v2 = vpack.c.bf16 %v266_v1, %v265_v63 }
  0x5e   :  { %579 = vmatpush3.bf16.msra.mxu0 %v578_v56 }
  0x5f   :  { %580 = vmatprep.subr.bf16.mxu0 %v706_v0 }
  0x62   :  { %582 = vmatpush3.bf16.msra.mxu0 %v581_v59 }
  0x63   :  { %583 = vmatprep.subr.bf16.mxu0 %v706_v0 }
  0x66   :  { %585 = vmatpush3.bf16.msra.mxu0 %v584_v62 }
  0x67   :  { %586 = vmatprep.subr.bf16.mxu0 %v706_v0 }
  0x6a   :  { %588 = vmatpush3.bf16.msra.mxu0 %v587_v2 }
  0x6b   :  { %589 = vmatprep.subr.bf16.mxu0 %v706_v0 }
  0x6e   :  { %591 = vmatpush3.bf16.msra.mxu0 %v590_v5 }
  0x6f   :  { %592 = vmatprep.subr.bf16.mxu0 %v706_v0 }
  0x72   :  { %594 = vmatpush3.bf16.msra.mxu0 %v593_v8 }
  0x73   :  { %595 = vmatprep.subr.bf16.mxu0 %v706_v0 }
  0x76   :  { %597 = vmatpush3.bf16.msra.mxu0 %v596_v16 }
 0x12c   :  { %v158_v10 = vpop.f32.mrb[0].mxu0 }
 0x12d   :  { %v159_v11 = vadd.f32 %v367_v9, %v158_v10  ;;  %v455_v12 = vpop.f32.mrb[1].mxu0 }
 0x12f   :  { %v162_v13 = vmax.f32 %v159_v11, 0.0 }
 0x131   :  { %489 = vmatmul.mubr.f32.vlgmr.msra.gmra.mrb[0].mxu1 %v162_v13 }
 0x204   :  { %v252_v18 = vpop.f32.mrb[0].mxu1 }
 0x205   :  { %v253_v19 = vadd.f32 %v368_v17, %v252_v18  ;;  %v490_v0 = vpop.f32.mrb[1].mxu1 }
 0x207   :  { %v256_v20 = vmax.f32 %v253_v19, 0.0 }
 0x209   :  { %524 = vmatmul.mubr.f32.vlgmr.msra.gmra.mrb[2].mxu0 %v256_v20 }
 0x2dc   :  { %v346_v22 = vpop.f32.mrb[2].mxu0 }
 0x2dd   :  { %v347_v23 = vadd.f32 %v369_v21, %v346_v22  ;;  %v525_v24 = vpop.f32.mrb[3].mxu0 }
 0x2df   :  { %350 = vst [vmem:[#allocation8] sm:$0xff] %v347_v23 }
 0x2e0   :  { %684 = shalt.err (!%p681_p0)
}
 0x2e1   :  { %s685_s23 = scalar_lea.hbm %s863_s7, 128 }
 0x2e2   :  { %p686_p1 = scmp.ne.s32.totalorder %s863_s7, %s685_s23  ;;  %p689_p2 = scmp.lt.u32.totalorder %s685_s23, %s863_s7 }
 0x2e4   :  { %p691_p3 = pnand %p689_p2, %p686_p1 }
 0x2e6   :  { %694 = shalt.err (!%p691_p3)
}
 0x2e7   :  { %360 = dma.vmem_to_hbm [thread:$0]  %s358_s20, 128, %s863_s7, [#allocation4]  }
 0x2e8   :  { %699 = dma.done.wait [#allocation4], 128  }
 0x2e9   :  { %700 = vsyncadd [#allocation4], 4294967168 }
 0x2ea   :  { %364 = vsyncpa [#allocation3], 1 }
 0x2eb   :  { %365 = vsyncpa [#allocation6], 1 }
 0x2ec   :  { %366 = vsyncpa [#allocation4], 1 }

</bundles_post_ra>
